<compile_context>
chip_gen: v7x
topology: tpu7x:2x2x1
jax: 0.10.0
libtpu: 0.0.40
codegen_flags: <defaults>
</compile_context>

<pallas_src>
import functools

import jax
import jax.numpy as jnp
from jax.experimental import pallas as pl
from jax.experimental.pallas import tpu as pltpu

EPS = 1e-5


def _vmem_limits():
    """Per-generation (vmem_limit_bytes, tile-picker budget) in bytes."""
    phys = 0
    try:
        info = pltpu.get_tpu_info()
        phys = int(getattr(info, "vmem_capacity_bytes", 0) or 0)
    except Exception:
        phys = 0
    if phys <= 0:
        phys = 64 * 1024 * 1024                    # conservative fallback: v7x physical
    limit = min((phys * 3) // 4, 112 * 1024 * 1024)  # ~96 MiB v5e/v6e, ~48 MiB v7x
    budget = max(limit - 6 * 1024 * 1024, 8 * 1024 * 1024)  # headroom for runtime/sems
    return int(limit), int(budget)


def _pick_tile_hw(hw, per_elem_bytes, fixed_bytes, budget_bytes):
    """Largest lane-dense spatial tile whose full working set fits the VMEM budget."""
    avail = max(budget_bytes - fixed_bytes, 128 * per_elem_bytes)
    max_tile = max(128, avail // per_elem_bytes)
    if hw <= max_tile:
        return int(hw)                    # full extent is always a legal block dim
    return int(max_tile // 128) * 128     # otherwise keep the lane axis 128-aligned


def _make_stats_kernel(hw, tile_hw, store_y):
    needs_mask = (hw % tile_hw) != 0      # static; only emitted for ragged HW

    def kernel(x_ref, w_ref, *out_refs):
        if store_y:
            y_ref, sum_ref, sq_ref = out_refs
        else:
            sum_ref, sq_ref = out_refs
        j = pl.program_id(1)

        # 1x1 conv on this spatial tile: (Cout, Cin) @ (Cin, tile_hw) on the MXU,
        # f32 accumulation regardless of (possibly bf16) operand dtype.
        y = jnp.dot(w_ref[...], x_ref[0], preferred_element_type=jnp.float32)

        if store_y:
            # Partial last block is masked on writeback by Pallas.
            y_ref[0] = y.astype(y_ref.dtype)

        if needs_mask:
            # Zero contributions from padded lanes of the ragged last block. This is
            # cheap VALU filler hidden under MXU/DMA (only present when HW % tile != 0).
            lane = jax.lax.broadcasted_iota(jnp.int32, y.shape, 1)
            valid = (j * tile_hw + lane) < hw
            ym = jnp.where(valid, y, 0.0)
        else:
            ym = y

        s = jnp.sum(ym, axis=-1, keepdims=True)          # (Cout, 1)
        sq = jnp.sum(ym * ym, axis=-1, keepdims=True)    # (Cout, 1)

        @pl.when(j == 0)
        def _():
            sum_ref[...] = jnp.zeros_like(sum_ref)
            sq_ref[...] = jnp.zeros_like(sq_ref)

        sum_ref[...] += s[None]
        sq_ref[...] += sq[None]

    return kernel


def _conv_affine_kernel(x_ref, w_ref, scale_ref, shift_ref, o_ref):
    # Recompute path: o = scale * (W @ x) + shift, scale/shift kept in f32.
    y = jnp.dot(w_ref[...], x_ref[0], preferred_element_type=jnp.float32)
    o_ref[0] = (y * scale_ref[...] + shift_ref[...]).astype(o_ref.dtype)


def _affine_kernel(y_ref, scale_ref, shift_ref, o_ref):
    # Store-y path: o = scale * y + shift (no MXU work).
    o_ref[0] = (y_ref[0].astype(jnp.float32) * scale_ref[...]
                + shift_ref[...]).astype(o_ref.dtype)


def conv_head_forward(x_nchw, conv_w, gamma, beta, *,
                      compute_dtype=jnp.bfloat16, _tile_hw_override=None):
    """x_nchw: (N, Cin, H, W); conv_w: (Cout, Cin, 1, 1); gamma/beta: (Cout,).

    Returns f32 (N, Cout, H, W) = BatchNorm2d(Conv2d_1x1(x)) with batch statistics;
    dropout(p=0.0) is the identity.
    """
    N, Cin, H, W = x_nchw.shape
    Cout, cin_w, kh, kw = conv_w.shape
    assert cin_w == Cin and kh == 1 and kw == 1, "only 1x1 conv supported"
    HW = H * W

    vmem_limit, vmem_budget = _vmem_limits()
    isz = jnp.dtype(compute_dtype).itemsize

    # Wide heads (Cin > 2*Cout): store y in pass 1, skip the pass-2 matmul.
    store_y = Cin > 2 * Cout

    # NCHW stays NCHW: just flatten spatial (free reshape, no transpose).
    x3d = x_nchw.reshape(N, Cin, HW).astype(compute_dtype)
    w2d = conv_w[:, :, 0, 0].astype(compute_dtype)             # (Cout, Cin)

    # ---- tile sizes with honest VMEM accounting (per pass) ----
    # pass 1: 2x x-block + f32 matmul temp (+ 2x y-block if stored); fixed: 2x weight.
    per_elem1 = 2 * Cin * isz + 4 * Cout + (2 * Cout * isz if store_y else 0)
    fixed1 = 2 * Cout * Cin * isz + (1 << 20)
    tile1 = _pick_tile_hw(HW, per_elem1, fixed1, vmem_budget)
    # pass 2: store-y -> 2x y-block + 2x f32 out-block + temp; recompute -> conv again.
    if store_y:
        per_elem2 = 2 * Cout * isz + 2 * Cout * 4 + 4 * Cout
        fixed2 = 1 << 20
    else:
        per_elem2 = 2 * Cin * isz + 2 * Cout * 4 + 4 * Cout
        fixed2 = 2 * Cout * Cin * isz + (1 << 20)
    tile2 = _pick_tile_hw(HW, per_elem2, fixed2, vmem_budget)
    if _tile_hw_override is not None:                          # test hook
        tile1 = tile2 = min(int(_tile_hw_override), HW)
    n_hw1 = pl.cdiv(HW, tile1)
    n_hw2 = pl.cdiv(HW, tile2)

    # ---- pass 1: per-batch partial channel sums / sums of squares (+ optional y) ----
    if store_y:
        out_shape1 = (
            jax.ShapeDtypeStruct((N, Cout, HW), compute_dtype),
            jax.ShapeDtypeStruct((N, Cout, 1), jnp.float32),
            jax.ShapeDtypeStruct((N, Cout, 1), jnp.float32),
        )
        out_specs1 = [
            pl.BlockSpec((1, Cout, tile1), lambda n, j: (n, 0, j)),
            pl.BlockSpec((1, Cout, 1), lambda n, j: (n, 0, 0)),
            pl.BlockSpec((1, Cout, 1), lambda n, j: (n, 0, 0)),
        ]
    else:
        out_shape1 = (
            jax.ShapeDtypeStruct((N, Cout, 1), jnp.float32),
            jax.ShapeDtypeStruct((N, Cout, 1), jnp.float32),
        )
        out_specs1 = [
            pl.BlockSpec((1, Cout, 1), lambda n, j: (n, 0, 0)),
            pl.BlockSpec((1, Cout, 1), lambda n, j: (n, 0, 0)),
        ]

    pass1 = pl.pallas_call(
        _make_stats_kernel(HW, tile1, store_y),
        out_shape=out_shape1,
        grid_spec=pltpu.PrefetchScalarGridSpec(
            num_scalar_prefetch=0,
            grid=(N, n_hw1),
            in_specs=[
                pl.BlockSpec((1, Cin, tile1), lambda n, j: (n, 0, j)),
                pl.BlockSpec((Cout, Cin), lambda n, j: (0, 0)),
            ],
            out_specs=out_specs1,
        ),
        compiler_params=pltpu.CompilerParams(
            dimension_semantics=("parallel", "arbitrary"),
            vmem_limit_bytes=vmem_limit,
        ),
    )
    if store_y:
        y3d, ch_sum, ch_sq = pass1(x3d, w2d)
    else:
        ch_sum, ch_sq = pass1(x3d, w2d)
        y3d = None

    # ---- glue: batch-stat BN folded into a single per-channel affine ----
    cnt = jnp.float32(N * HW)
    mean = jnp.sum(ch_sum[:, :, 0], axis=0) / cnt                          # (Cout,)
    var = jnp.maximum(jnp.sum(ch_sq[:, :, 0], axis=0) / cnt - mean * mean, 0.0)
    inv_std = jax.lax.rsqrt(var + EPS)
    scale = gamma.astype(jnp.float32) * inv_std                            # (Cout,)
    shift = beta.astype(jnp.float32) - mean * scale                        # (Cout,)
    scale2d = scale[:, None]                                               # (Cout, 1)
    shift2d = shift[:, None]                                               # (Cout, 1)

    # ---- pass 2: per-channel affine (store-y) or fused conv + affine (recompute) ----
    if store_y:
        kernel2 = _affine_kernel
        operands = (y3d, scale2d, shift2d)
        in_specs2 = [
            pl.BlockSpec((1, Cout, tile2), lambda n, j: (n, 0, j)),
            pl.BlockSpec((Cout, 1), lambda n, j: (0, 0)),
            pl.BlockSpec((Cout, 1), lambda n, j: (0, 0)),
        ]
    else:
        kernel2 = _conv_affine_kernel
        operands = (x3d, w2d, scale2d, shift2d)
        in_specs2 = [
            pl.BlockSpec((1, Cin, tile2), lambda n, j: (n, 0, j)),
            pl.BlockSpec((Cout, Cin), lambda n, j: (0, 0)),
            pl.BlockSpec((Cout, 1), lambda n, j: (0, 0)),
            pl.BlockSpec((Cout, 1), lambda n, j: (0, 0)),
        ]

    o3d = pl.pallas_call(
        kernel2,
        out_shape=jax.ShapeDtypeStruct((N, Cout, HW), jnp.float32),
        grid_spec=pltpu.PrefetchScalarGridSpec(
            num_scalar_prefetch=0,
            grid=(N, n_hw2),
            in_specs=in_specs2,
            out_specs=pl.BlockSpec((1, Cout, tile2), lambda n, j: (n, 0, j)),
        ),
        compiler_params=pltpu.CompilerParams(
            dimension_semantics=("parallel", "parallel"),
            vmem_limit_bytes=vmem_limit,
        ),
    )(*operands)

    return o3d.reshape(N, Cout, H, W)


def _reference(x_nchw, conv_w, gamma, beta):
    # Pure-JAX f32 reference of the same semantics (Conv2d k=1 no bias -> BN batch stats).
    Cout = conv_w.shape[0]
    y = jnp.einsum("nchw,oc->nohw", x_nchw, conv_w[:, :, 0, 0])
    mean = jnp.mean(y, axis=(0, 2, 3), keepdims=True)
    var = jnp.mean((y - mean) ** 2, axis=(0, 2, 3), keepdims=True)
    yhat = (y - mean) * jax.lax.rsqrt(var + EPS)
    return yhat * gamma.reshape(1, Cout, 1, 1) + beta.reshape(1, Cout, 1, 1)


if __name__ == "__main__":
    k_x, k_w = jax.random.split(jax.random.PRNGKey(0))

    # (N, Cin, Cout, H, W, compute_dtype, atol, rtol, tile_hw_override)
    cases = [
        # recompute path (Cin <= 2*Cout), single spatial block, exact f32
        (2, 4, 8, 16, 16, jnp.float32, 1e-4, 1e-4, None),
        # recompute path, bf16 operands (default production config), looser tolerance
        (2, 4, 8, 16, 16, jnp.bfloat16, 1e-1, 5e-2, None),
        # store-y path (Cin > 2*Cout), exact f32
        (2, 32, 8, 16, 16, jnp.float32, 1e-4, 1e-4, None),
        # recompute path, ragged HW across multiple 128-wide tiles (mask + accumulation)
        (2, 4, 8, 20, 20, jnp.float32, 1e-4, 1e-4, 128),
        # store-y path, ragged HW across multiple 128-wide tiles
        (2, 32, 8, 20, 20, jnp.float32, 1e-4, 1e-4, 128),
    ]

    for idx, (N, Cin, Cout, H, W, cdt, atol, rtol, tile) in enumerate(cases):
        x = jax.random.normal(k_x, (N, Cin, H, W), dtype=jnp.float32)
        # Conv2d weight init: normal(0, 0.01), shape (Cout, Cin, 1, 1), bias=False.
        conv_w = 0.01 * jax.random.normal(k_w, (Cout, Cin, 1, 1), dtype=jnp.float32)
        # BatchNorm2d params: weight=1, bias=0.
        gamma = jnp.ones((Cout,), dtype=jnp.float32)
        beta = jnp.zeros((Cout,), dtype=jnp.float32)

        fwd = jax.jit(functools.partial(conv_head_forward,
                                        compute_dtype=cdt,
                                        _tile_hw_override=tile))
        out = jax.block_until_ready(fwd(x, conv_w, gamma, beta))
        ref = _reference(x, conv_w, gamma, beta)

        assert out.shape == (N, Cout, H, W), f"case {idx}: bad shape {out.shape}"
        err = jnp.max(jnp.abs(out.astype(jnp.float32) - ref))
        assert jnp.allclose(out.astype(jnp.float32), ref, atol=atol, rtol=rtol), (
            f"case {idx}: mismatch vs reference (max abs err {float(err):.3e})")

    print("KERNEL_OK")
</pallas_src>

<mosaic_0001>
module attributes {stable_mosaic.version = 11 : i64} {
  func.func @kernel(%arg0: i32, %arg1: i32, %arg2: memref<1x4x256xf32, #tpu.memory_space<vmem>>, %arg3: memref<8x4xf32, #tpu.memory_space<vmem>>, %arg4: memref<1x8x1xf32, #tpu.memory_space<vmem>>, %arg5: memref<1x8x1xf32, #tpu.memory_space<vmem>>) attributes {dimension_semantics = [#tpu.dimension_semantics<parallel>, #tpu.dimension_semantics<arbitrary>], iteration_bounds = array<i64: 2, 1>, scalar_prefetch = 0 : i64, scratch_operands = 0 : i64, tpu.core_type = #tpu.core_type<tc>, window_params = [{transform_indices = @transform_0, window_bounds = array<i64: 1, 4, 256>}, {pipeline_mode = #tpu.pipeline_mode<synchronous>, transform_indices = @transform_1, window_bounds = array<i64: 8, 4>}, {transform_indices = @transform_2, window_bounds = array<i64: 1, 8, 1>}, {transform_indices = @transform_3, window_bounds = array<i64: 1, 8, 1>}]} {
    %c0 = arith.constant 0 : index
    %c0_0 = arith.constant 0 : index
    %0 = vector.load %arg3[%c0, %c0_0] : memref<8x4xf32, #tpu.memory_space<vmem>>, vector<8x4xf32>
    %c0_1 = arith.constant 0 : index
    %c0_2 = arith.constant 0 : index
    %c0_3 = arith.constant 0 : index
    %1 = vector.load %arg2[%c0_1, %c0_2, %c0_3] : memref<1x4x256xf32, #tpu.memory_space<vmem>>, vector<1x4x256xf32>
    %2 = vector.shape_cast %1 : vector<1x4x256xf32> to vector<4x256xf32>
    %cst = arith.constant dense<0.000000e+00> : vector<8x256xf32>
    %3 = tpu.matmul %0, %2, %cst {dimension_numbers = #tpu.dot_dimension_numbers<[1], [0], [0], [1], [0, 0, 1, 1], [], []>} : vector<8x4xf32>, vector<4x256xf32>, vector<8x256xf32> -> vector<8x256xf32>
    %cst_4 = arith.constant dense<0.000000e+00> : vector<8xf32>
    %4 = vector.multi_reduction <add>, %3, %cst_4 [1] : vector<8x256xf32> to vector<8xf32>
    %5 = vector.shape_cast %4 : vector<8xf32> to vector<8x1xf32>
    %6 = arith.mulf %3, %3 : vector<8x256xf32>
    %cst_5 = arith.constant dense<0.000000e+00> : vector<8xf32>
    %7 = vector.multi_reduction <add>, %6, %cst_5 [1] : vector<8x256xf32> to vector<8xf32>
    %8 = vector.shape_cast %7 : vector<8xf32> to vector<8x1xf32>
    %c0_i32 = arith.constant 0 : i32
    %9 = arith.cmpi eq, %arg1, %c0_i32 : i32
    %10 = arith.extui %9 : i1 to i32
    %c0_i32_6 = arith.constant 0 : i32
    %11 = arith.cmpi ne, %10, %c0_i32_6 : i32
    scf.if %11 {
      %cst_19 = arith.constant 0.000000e+00 : f32
      %20 = vector.broadcast %cst_19 : f32 to vector<1x8x1xf32>
      %c0_20 = arith.constant 0 : index
      %c0_21 = arith.constant 0 : index
      %c0_22 = arith.constant 0 : index
      %21 = vector.load %arg4[%c0_20, %c0_21, %c0_22] : memref<1x8x1xf32, #tpu.memory_space<vmem>>, vector<1x8x1xf32>
      tpu.vector_store %arg4[%c0_20, %c0_21, %c0_22], %20 {strides = array<i32>} : memref<1x8x1xf32, #tpu.memory_space<vmem>>, vector<1x8x1xf32>,
      %cst_23 = arith.constant 0.000000e+00 : f32
      %22 = vector.broadcast %cst_23 : f32 to vector<1x8x1xf32>
      %c0_24 = arith.constant 0 : index
      %c0_25 = arith.constant 0 : index
      %c0_26 = arith.constant 0 : index
      %23 = vector.load %arg5[%c0_24, %c0_25, %c0_26] : memref<1x8x1xf32, #tpu.memory_space<vmem>>, vector<1x8x1xf32>
      tpu.vector_store %arg5[%c0_24, %c0_25, %c0_26], %22 {strides = array<i32>} : memref<1x8x1xf32, #tpu.memory_space<vmem>>, vector<1x8x1xf32>,
    } else {
    }
    %c0_7 = arith.constant 0 : index
    %c0_8 = arith.constant 0 : index
    %c0_9 = arith.constant 0 : index
    %12 = vector.load %arg4[%c0_7, %c0_8, %c0_9] : memref<1x8x1xf32, #tpu.memory_space<vmem>>, vector<1x8x1xf32>
    %13 = vector.shape_cast %5 : vector<8x1xf32> to vector<1x8x1xf32>
    %14 = arith.addf %12, %13 : vector<1x8x1xf32>
    %c0_10 = arith.constant 0 : index
    %c0_11 = arith.constant 0 : index
    %c0_12 = arith.constant 0 : index
    %15 = vector.load %arg4[%c0_10, %c0_11, %c0_12] : memref<1x8x1xf32, #tpu.memory_space<vmem>>, vector<1x8x1xf32>
    tpu.vector_store %arg4[%c0_10, %c0_11, %c0_12], %14 {strides = array<i32>} : memref<1x8x1xf32, #tpu.memory_space<vmem>>, vector<1x8x1xf32>,
    %c0_13 = arith.constant 0 : index
    %c0_14 = arith.constant 0 : index
    %c0_15 = arith.constant 0 : index
    %16 = vector.load %arg5[%c0_13, %c0_14, %c0_15] : memref<1x8x1xf32, #tpu.memory_space<vmem>>, vector<1x8x1xf32>
    %17 = vector.shape_cast %8 : vector<8x1xf32> to vector<1x8x1xf32>
    %18 = arith.addf %16, %17 : vector<1x8x1xf32>
    %c0_16 = arith.constant 0 : index
    %c0_17 = arith.constant 0 : index
    %c0_18 = arith.constant 0 : index
    %19 = vector.load %arg5[%c0_16, %c0_17, %c0_18] : memref<1x8x1xf32, #tpu.memory_space<vmem>>, vector<1x8x1xf32>
    tpu.vector_store %arg5[%c0_16, %c0_17, %c0_18], %18 {strides = array<i32>} : memref<1x8x1xf32, #tpu.memory_space<vmem>>, vector<1x8x1xf32>,
    return
  }
  func.func @transform_0(%arg0: i32, %arg1: i32) -> (i32, i32, i32) {
    %c0_i32 = arith.constant 0 : i32
    %c0_i32_0 = arith.constant 0 : i32
    return %arg0, %c0_i32, %arg1 : i32, i32, i32
  }
  func.func @transform_1(%arg0: i32, %arg1: i32) -> (i32, i32) {
    %c0_i32 = arith.constant 0 : i32
    %c0_i32_0 = arith.constant 0 : i32
    %c0_i32_1 = arith.constant 0 : i32
    return %c0_i32, %c0_i32_0 : i32, i32
  }
  func.func @transform_2(%arg0: i32, %arg1: i32) -> (i32, i32, i32) {
    %c0_i32 = arith.constant 0 : i32
    %c0_i32_0 = arith.constant 0 : i32
    %c0_i32_1 = arith.constant 0 : i32
    return %arg0, %c0_i32, %c0_i32_0 : i32, i32, i32
  }
  func.func @transform_3(%arg0: i32, %arg1: i32) -> (i32, i32, i32) {
    %c0_i32 = arith.constant 0 : i32
    %c0_i32_0 = arith.constant 0 : i32
    %c0_i32_1 = arith.constant 0 : i32
    return %arg0, %c0_i32, %c0_i32_0 : i32, i32, i32
  }
}

module attributes {stable_mosaic.version = 11 : i64} {
  func.func @_conv_affine_kernel(%arg0: i32, %arg1: i32, %arg2: memref<1x4x256xf32, #tpu.memory_space<vmem>>, %arg3: memref<8x4xf32, #tpu.memory_space<vmem>>, %arg4: memref<8x1xf32, #tpu.memory_space<vmem>>, %arg5: memref<8x1xf32, #tpu.memory_space<vmem>>, %arg6: memref<1x8x256xf32, #tpu.memory_space<vmem>>) attributes {dimension_semantics = [#tpu.dimension_semantics<parallel>, #tpu.dimension_semantics<parallel>], iteration_bounds = array<i64: 2, 1>, scalar_prefetch = 0 : i64, scratch_operands = 0 : i64, tpu.core_type = #tpu.core_type<tc>, window_params = [{transform_indices = @transform_0, window_bounds = array<i64: 1, 4, 256>}, {pipeline_mode = #tpu.pipeline_mode<synchronous>, transform_indices = @transform_1, window_bounds = array<i64: 8, 4>}, {pipeline_mode = #tpu.pipeline_mode<synchronous>, transform_indices = @transform_2, window_bounds = array<i64: 8, 1>}, {pipeline_mode = #tpu.pipeline_mode<synchronous>, transform_indices = @transform_3, window_bounds = array<i64: 8, 1>}, {transform_indices = @transform_4, window_bounds = array<i64: 1, 8, 256>}]} {
    %c0 = arith.constant 0 : index
    %c0_0 = arith.constant 0 : index
    %0 = vector.load %arg3[%c0, %c0_0] : memref<8x4xf32, #tpu.memory_space<vmem>>, vector<8x4xf32>
    %c0_1 = arith.constant 0 : index
    %c0_2 = arith.constant 0 : index
    %c0_3 = arith.constant 0 : index
    %1 = vector.load %arg2[%c0_1, %c0_2, %c0_3] : memref<1x4x256xf32, #tpu.memory_space<vmem>>, vector<1x4x256xf32>
    %2 = vector.shape_cast %1 : vector<1x4x256xf32> to vector<4x256xf32>
    %cst = arith.constant dense<0.000000e+00> : vector<8x256xf32>
    %3 = tpu.matmul %0, %2, %cst {dimension_numbers = #tpu.dot_dimension_numbers<[1], [0], [0], [1], [0, 0, 1, 1], [], []>} : vector<8x4xf32>, vector<4x256xf32>, vector<8x256xf32> -> vector<8x256xf32>
    %c0_4 = arith.constant 0 : index
    %c0_5 = arith.constant 0 : index
    %4 = vector.load %arg4[%c0_4, %c0_5] : memref<8x1xf32, #tpu.memory_space<vmem>>, vector<8x1xf32>
    %5 = vector.broadcast %4 : vector<8x1xf32> to vector<8x256xf32>
    %6 = arith.mulf %3, %5 : vector<8x256xf32>
    %c0_6 = arith.constant 0 : index
    %c0_7 = arith.constant 0 : index
    %7 = vector.load %arg5[%c0_6, %c0_7] : memref<8x1xf32, #tpu.memory_space<vmem>>, vector<8x1xf32>
    %8 = vector.broadcast %7 : vector<8x1xf32> to vector<8x256xf32>
    %9 = arith.addf %6, %8 : vector<8x256xf32>
    %c0_8 = arith.constant 0 : index
    %c0_9 = arith.constant 0 : index
    %c0_10 = arith.constant 0 : index
    %10 = vector.load %arg6[%c0_8, %c0_9, %c0_10] : memref<1x8x256xf32, #tpu.memory_space<vmem>>, vector<1x8x256xf32>
    %11 = vector.shape_cast %10 : vector<1x8x256xf32> to vector<8x256xf32>
    %12 = vector.shape_cast %9 : vector<8x256xf32> to vector<1x8x256xf32>
    tpu.vector_store %arg6[%c0_8, %c0_9, %c0_10], %12 {strides = array<i32>} : memref<1x8x256xf32, #tpu.memory_space<vmem>>, vector<1x8x256xf32>,
    return
  }
  func.func @transform_0(%arg0: i32, %arg1: i32) -> (i32, i32, i32) {
    %c0_i32 = arith.constant 0 : i32
    %c0_i32_0 = arith.constant 0 : i32
    return %arg0, %c0_i32, %arg1 : i32, i32, i32
  }
  func.func @transform_1(%arg0: i32, %arg1: i32) -> (i32, i32) {
    %c0_i32 = arith.constant 0 : i32
    %c0_i32_0 = arith.constant 0 : i32
    %c0_i32_1 = arith.constant 0 : i32
    return %c0_i32, %c0_i32_0 : i32, i32
  }
  func.func @transform_2(%arg0: i32, %arg1: i32) -> (i32, i32) {
    %c0_i32 = arith.constant 0 : i32
    %c0_i32_0 = arith.constant 0 : i32
    %c0_i32_1 = arith.constant 0 : i32
    return %c0_i32, %c0_i32_0 : i32, i32
  }
  func.func @transform_3(%arg0: i32, %arg1: i32) -> (i32, i32) {
    %c0_i32 = arith.constant 0 : i32
    %c0_i32_0 = arith.constant 0 : i32
    %c0_i32_1 = arith.constant 0 : i32
    return %c0_i32, %c0_i32_0 : i32, i32
  }
  func.func @transform_4(%arg0: i32, %arg1: i32) -> (i32, i32, i32) {
    %c0_i32 = arith.constant 0 : i32
    %c0_i32_0 = arith.constant 0 : i32
    return %arg0, %c0_i32, %arg1 : i32, i32, i32
  }
}

</mosaic_0001>

<bundles_post_ra>
// kernel: conv_head_forward.2
= control target key start
LH: loop header
LB: loop body
LE: loop exit
PB: predicated region body
PF: predicated region fallthrough
CT: control target
= control target key end

     0   :  { %s498_s12 = smov 0   ;;  %s500_s13 = smov 0   ;;  %s541_s0 = inlined_call_operand.vmem [shape: f32[2,4,256], index: 0, kind: input, shape index: {}]   ;;  %s542_s1 = inlined_call_operand.vmem [shape: f32[8,4], index: 1, kind: input, shape index: {}]   ;;  %s543_s2 = inlined_call_operand.vmem [shape: f32[2,8,1], index: 2, kind: output, shape index: {0}]   ;;  %s544_s3 = inlined_call_operand.vmem [shape: f32[2,8,1], index: 3, kind: output, shape index: {1}]  }
   0x1   :  { %s502_s14 = smov 0  }
   0x2 LB: > { %s26_s15 = sadd.s32 1, %s471_s13  ;;  %p416_p0 = scmp.ge.s32.totalorder %s475_s14, 1  ;;  %s475_s14 = sphi %s502_s14, %s14_s14   ;;  %s471_s13 = sphi %s500_s13, %s546_s13   ;;  %s467_s12 = sphi %s498_s12, %s545_s12  }
   0x3   : > { %p28_p1 = scmp.ge.s32.totalorder %s26_s15, 2  ;;  %p159_p2 = scmp.lt.s32.totalorder %s475_s14, 3 }
   0x5   : > { %s548_s15 = smov (%p28_p1, %s26_s15), 0  ;;  %p160_p3 = pnand %p416_p0, %p159_p2 }
   0x6   : > { %p191_p4 = scmp.lt.s32.totalorder (!%p160_p3), %s467_s12, 1  ;;  %v477_v0 = vmov (!%p160_p3), 0.0   ;;  %vm216_vm0 = vcmask (!%p160_p3), 1043456   ;;  %v208_v3 = vld [vmem:[%s542_s1] sm:$0xff] (!%p160_p3)  ;;  %vm212_vm1 = vcmask (!%p160_p3), 31744   ;;  %vm304_vm2 = vcmask (!%p160_p3), 7168  }
   0x7   : > { %163 = sbr.rel (%p160_p3) target bundleno = 386 (0x182), region = 28  ;;  %285 = vmatprep.mubr.f32.mxu0 (!%p160_p3), %v477_v0 }
   0xe   : > { %s550_s12 = smov (!%p191_p4, %s467_s12), 1 }
   0xf   : > { %s426_s16 = sshll.u32 %s550_s12, 3 }
  0x10   : > { %s198_s19 = scalar_lea.vmem %s541_s0, %s426_s16  ;;  %s203_s24 = scalar_lea.vmem %s543_s2, %s426_s16 }
  0x11   : > { %v209_v1 = vld [vmem:[%s198_s19] sm:$0xff]  ;;  %305 = vst.msk [vmem:[%s203_s24] sm:$0xff] %vm304_vm2, %v477_v0  ;;  %s207_s27 = scalar_lea.vmem %s544_s3, %s426_s16 }
  0x12   : > { %v211_v2 = vcombine.high %v209_v1, %v209_v1  ;;  %306 = vst.msk [vmem:[%s207_s27] sm:$0xff] %vm304_vm2, %v477_v0 }
  0x14   : > { %421 = vmatprep.subr.msk.mxu0 %vm216_vm0, %v211_v2 }
  0x15   : > { %422 = vmatpush1.msk.msra.mxu0 %vm216_vm0, %v209_v1 }
  0x16   : > { %423 = vmatmul.mubr.msk.f32.vlgmr.msra.gmra.mrb[0].mxu0 %vm212_vm1, %v208_v3 }
  0x18   : > { %v307_v10 = vld [vmem:[%s203_s24] sm:$0xff] }
  0x19   : > { %v311_v13 = vld [vmem:[%s207_s27] sm:$0xff] }
  0xe9   : > { %v287_v4 = vpop.f32.mrb[0].mxu0 }
  0xea   : > { %v295_v5 = vmul.f32 %v287_v4, %v287_v4  ;;  %v289_v6 = vpop.f32.mrb[1].mxu0 }
  0xeb   : > { %v296_v7 = vmul.f32 %v289_v6, %v289_v6  ;;  %v292_v8 = vadd.f32 %v289_v6, %v287_v4 }
  0xed   : > { %293 = vadd.xlane.f32.xlu0 %v292_v8  ;;  %v297_v9 = vadd.f32 %v296_v7, %v295_v5 }
  0xf1   : > { %298 = vadd.xlane.f32.xlu0 %v297_v9 }
 0x17a   : > { %v294_v11 = vpop.xlane.xlu0 %293 }
 0x17b   : > { %v308_v12 = vadd.f32 %v307_v10, %v294_v11 }
 0x17d   : > { %310 = vst.msk [vmem:[%s203_s24] sm:$0xff] %vm304_vm2, %v308_v12 }
 0x17e   : > { %v299_v14 = vpop.xlane.xlu0 %298 }
 0x17f   : > { %v312_v15 = vadd.f32 %v311_v13, %v299_v14 }
 0x181   : > { %313 = vst.msk [vmem:[%s207_s27] sm:$0xff] %vm304_vm2, %v312_v15 }
 0x182 PF: > { %s14_s14 = sadd.s32 1, %s475_s14   ;;  %s545_s12 = smov %s471_s13 }
 0x183   : > { %p11_p5 = scmp.ge.s32.totalorder %s14_s14, 4   ;;  %s546_s13 = smov %s548_s15 }
 0x185   :  { %13 = sbr.rel (!%p11_p5) target bundleno = 2 (0x2), region = 74 }

// kernel: conv_head_forward.3
= control target key start
LH: loop header
LB: loop body
LE: loop exit
PB: predicated region body
PF: predicated region fallthrough
CT: control target
= control target key end

     0   :  { %s521_s15 = smov 0   ;;  %s523_s16 = smov 0   ;;  %s563_s0 = inlined_call_operand.vmem [shape: f32[2,4,256], index: 0, kind: input, shape index: {}]   ;;  %s564_s1 = inlined_call_operand.vmem [shape: f32[8,4], index: 1, kind: input, shape index: {}]   ;;  %s565_s2 = inlined_call_operand.vmem [shape: f32[8,1], index: 2, kind: input, shape index: {}]   ;;  %s566_s3 = inlined_call_operand.vmem [shape: f32[8,1], index: 3, kind: input, shape index: {}]   ;;  %s567_s4 = inlined_call_operand.vmem [shape: f32[2,8,256], index: 4, kind: output, shape index: {}]  }
   0x1   :  { %s525_s17 = smov 0  }
   0x2 LB: > { %s26_s18 = sadd.s32 1, %s488_s16  ;;  %p430_p0 = scmp.ge.s32.totalorder %s492_s17, 1  ;;  %s492_s17 = sphi %s525_s17, %s14_s17   ;;  %s488_s16 = sphi %s523_s16, %s569_s16   ;;  %s484_s15 = sphi %s521_s15, %s568_s15  }
   0x3   : > { %p28_p1 = scmp.ge.s32.totalorder %s26_s18, 2  ;;  %p183_p2 = scmp.lt.s32.totalorder %s492_s17, 3 }
   0x5   : > { %s571_s18 = smov (%p28_p1, %s26_s18), 0  ;;  %p184_p3 = pnand %p430_p0, %p183_p2 }
   0x6   : > { %p218_p4 = scmp.lt.s32.totalorder (!%p184_p3), %s484_s15, 1  ;;  %v494_v0 = vmov (!%p184_p3), 0.0   ;;  %v495_v1 = vmov (!%p184_p3), 0   ;;  %v321_v2 = vld [vmem:[%s565_s2] sm:$0xff] (!%p184_p3)  ;;  %vm245_vm0 = vcmask (!%p184_p3), 1043456   ;;  %vm241_vm1 = vcmask (!%p184_p3), 31744  }
   0x7   : > { %187 = sbr.rel (%p184_p3) target bundleno = 240 (0xf0), region = 36  ;;  %314 = vmatprep.mubr.f32.mxu0 (!%p184_p3), %v494_v0  ;;  %468 = vset.pattern.permute.xlu0 (!%p184_p3), %v495_v1  ;;  %v329_v3 = vld [vmem:[%s566_s3] sm:$0xff] (!%p184_p3) }
   0x8   : > { %324 = vperm.xlu0 (!%p184_p3), %468, %v321_v2   ;;  %v237_v6 = vld [vmem:[%s564_s1] sm:$0xff] (!%p184_p3) }
   0xc   : > { %332 = vperm.xlu0 (!%p184_p3), %468, %v329_v3  }
   0xe   : > { %s573_s15 = smov (!%p218_p4, %s484_s15), 1 }
   0xf   : > { %s440_s23 = sshll.u32 %s573_s15, 3  ;;  %s441_s29 = sshll.u32 %s573_s15, 4 }
  0x10   : > { %s225_s26 = scalar_lea.vmem %s563_s0, %s440_s23  ;;  %s235_s6 = scalar_lea.vmem %s567_s4, %s441_s29 }
  0x11   : > { %v238_v4 = vld [vmem:[%s225_s26] sm:$0xff] }
  0x12   : > { %v240_v5 = vcombine.high %v238_v4, %v238_v4 }
  0x14   : > { %435 = vmatprep.subr.msk.mxu0 %vm245_vm0, %v240_v5 }
  0x15   : > { %436 = vmatpush1.msk.msra.mxu0 %vm245_vm0, %v238_v4 }
  0x16   : > { %437 = vmatmul.mubr.msk.f32.vlgmr.msra.gmra.mrb[0].mxu0 %vm241_vm1, %v237_v6 }
  0x87   : > { %v325_v7 = vpop.permute.xlu0 %324 }
  0x8b   : > { %v333_v11 = vpop.permute.xlu0 %332 }
  0xe9   : > { %v316_v8 = vpop.f32.mrb[0].mxu0 }
  0xea   : > { %v327_v9 = vmul.f32 %v325_v7, %v316_v8  ;;  %v318_v10 = vpop.f32.mrb[1].mxu0 }
  0xeb   : > { %v328_v12 = vmul.f32 %v325_v7, %v318_v10 }
  0xec   : > { %v335_v13 = vadd.f32 %v333_v11, %v327_v9 }
  0xed   : > { %v336_v14 = vadd.f32 %v333_v11, %v328_v12 }
  0xee   : > { %337 = vst [vmem:[%s235_s6] sm:$0xff] %v335_v13 }
  0xef   : > { %338 = vst [vmem:[%s235_s6 + $0x8] sm:$0xff] %v336_v14 }
  0xf0 PF: > { %s14_s17 = sadd.s32 1, %s492_s17   ;;  %s568_s15 = smov %s488_s16 }
  0xf1   : > { %p11_p5 = scmp.ge.s32.totalorder %s14_s17, 4   ;;  %s569_s16 = smov %s571_s18 }
  0xf3   :  { %13 = sbr.rel (!%p11_p5) target bundleno = 2 (0x2), region = 66 }

</bundles_post_ra>
